<compile_context>
chip_gen: v7x
topology: tpu7x:2x2x1
jax: 0.10.0
libtpu: 0.0.40
codegen_flags: <defaults>
</compile_context>

<pallas_src>
import math

import jax
import jax.numpy as jnp
from jax import lax
from jax.experimental import pallas as pl
from jax.experimental.pallas import tpu as pltpu

# ----------------------------------------------------------------------------
# CLIP constants
# ----------------------------------------------------------------------------
_CLIP_MEAN = (0.48145466, 0.4578275, 0.40821073)
_CLIP_STD = (0.26862954, 0.26130258, 0.27577711)
_LOGIT_SCALE = math.exp(math.log(1.0 / 0.07))  # logit_scale.exp() at init

_D_PAD = 128          # embed_dim padded to a full lane width
_EPS = 1e-12
_MAX_BN = 256         # max batch rows per MXU pass / per grid batch tile
# Conservative streaming-tile budget: fits v5e's 16 MiB scoped-VMEM default and
# v7x's halved (64 MiB physical / 32 MiB scoped) VMEM with headroom.
_VMEM_TILE_BUDGET = 12 << 20


def _round_up(x, m):
    return ((x + m - 1) // m) * m


def _pick_tk(f_pad, bn):
    """Largest K tile whose double-buffered streaming tiles fit the budget."""
    def stream_bytes(tk):
        # double-buffered imgs tile (f32) + double-buffered W' tile (bf16)
        return 2 * (bn * tk * 4) + 2 * (tk * _D_PAD * 2)

    if stream_bytes(f_pad) <= _VMEM_TILE_BUDGET:
        return f_pad                      # collapse the reduction axis entirely
    for m in range(f_pad // 128, 0, -1):
        tk = m * 128
        if f_pad % tk == 0 and stream_bytes(tk) <= _VMEM_TILE_BUDGET:
            return tk
    return 128


# ----------------------------------------------------------------------------
# Fused kernel: projection (K-tiled, f32 accumulator) -> L2 normalize ->
#               image@text similarities -> masked select -> per-key sums.
# ----------------------------------------------------------------------------
def _fused_kernel(imgs_ref, w_ref, b_ref, txt_ref, mask_ref, keymap_ref,
                  out_ref, acc_ref):
    ki = pl.program_id(1)

    @pl.when(ki == 0)
    def _init():
        acc_ref[...] = jnp.zeros_like(acc_ref)

    # Partial projection: (bn, tk)f32 -> bf16 cast in-kernel -> MXU -> f32 acc.
    acc_ref[...] += jnp.dot(imgs_ref[...].astype(jnp.bfloat16), w_ref[...],
                            preferred_element_type=jnp.float32)

    @pl.when(ki == pl.num_programs(1) - 1)
    def _finalize():
        # Bias (folded normalization) + L2 row-normalize in f32.
        enc = acc_ref[...] + b_ref[...]                           # (bn, D_PAD)
        inv_norm = lax.rsqrt(jnp.maximum(
            jnp.sum(enc * enc, axis=-1, keepdims=True), _EPS))
        img_enc = (enc * inv_norm).astype(jnp.bfloat16)

        # Similarities vs the concatenated (pre-transposed) text buffer.
        sims = jnp.dot(img_enc, txt_ref[...],
                       preferred_element_type=jnp.float32)        # (bn, P_PAD)

        # Precomputed selection mask (logit_scale/(100*n) folded in; padded
        # image rows are all-zero) -> per-key partial sums, lane-dense.
        masked = sims * mask_ref[...]                             # (bn, P_PAD)
        bn, p_pad = masked.shape
        part = jnp.sum(masked.reshape(bn // 8, 8, p_pad), axis=0)  # (8, P_PAD)
        out_ref[...] = jnp.dot(part, keymap_ref[...],
                               preferred_element_type=jnp.float32)  # (8,NK_PAD)


def _multi_clip_pallas(imgs_flat, w_fused, b_fused, txt_t, mask, key_map,
                       *, bn, tk):
    n_pad, f_pad = imgs_flat.shape
    d_pad = w_fused.shape[1]
    p_pad = txt_t.shape[1]
    nk_pad = key_map.shape[1]
    bt = n_pad // bn
    kt = f_pad // tk

    out = pl.pallas_call(
        _fused_kernel,
        out_shape=jax.ShapeDtypeStruct((bt * 8, nk_pad), jnp.float32),
        grid_spec=pltpu.PrefetchScalarGridSpec(
            num_scalar_prefetch=0,
            grid=(bt, kt),                       # (batch tiles, K reduction)
            in_specs=[
                pl.BlockSpec((bn, tk), lambda bi, ki: (bi, ki)),       # imgs f32
                pl.BlockSpec((tk, d_pad), lambda bi, ki: (ki, 0)),     # W' bf16
                pl.BlockSpec((1, d_pad), lambda bi, ki: (0, 0)),       # b' f32
                pl.BlockSpec((d_pad, p_pad), lambda bi, ki: (0, 0)),   # text^T
                pl.BlockSpec((bn, p_pad), lambda bi, ki: (bi, 0)),     # mask
                pl.BlockSpec((p_pad, nk_pad), lambda bi, ki: (0, 0)),  # key map
            ],
            out_specs=pl.BlockSpec((8, nk_pad), lambda bi, ki: (bi, 0)),
            scratch_shapes=[pltpu.VMEM((bn, d_pad), jnp.float32)],     # f32 acc
        ),
        compiler_params=pltpu.CompilerParams(
            dimension_semantics=("parallel", "arbitrary"),
        ),
    )(imgs_flat, w_fused, b_fused, txt_t, mask, key_map)
    return out   # (bt*8, NK_PAD) partial per-key sums (scale already applied)


# ----------------------------------------------------------------------------
# Module wrapper mirroring MultiTextClipLoss
# ----------------------------------------------------------------------------
class MultiTextClipLoss:
    def __init__(self, target_texts, rng_key, *, embed_dim=32, img_hw=16, img_ch=3):
        assert img_ch == 3
        self.embed_dim = embed_dim
        self.logit_scale = float(_LOGIT_SCALE)

        keys = jax.random.split(rng_key, len(target_texts) + 1)

        # Per-key "text encodings" (stand-in buffers), unit-normalized, then
        # concatenated into one (P_total, d) buffer with a static layout.
        self.text_keys = []
        self.key_layout = []          # (offset, count) per key
        enc_blocks = []
        off = 0
        for ki, (k, prompts) in enumerate(target_texts.items()):
            assert k != "all", '"all" is a special keyword'
            self.text_keys.append(k)
            p = len(prompts)
            enc = jax.random.normal(keys[ki], (p, embed_dim), jnp.float32)
            enc = enc / jnp.linalg.norm(enc, axis=-1, keepdims=True)
            enc_blocks.append(enc)
            self.key_layout.append((off, p))
            off += p
        p_total = off

        self.p_pad = max(128, _round_up(p_total, 128))
        self.nk_pad = max(128, _round_up(len(self.text_keys), 128))

        # Zero-pad (after normalization, so norms/dots are unchanged) and
        # pre-transpose to (D_PAD, P_PAD) so the in-kernel contraction is the
        # standard ((1,),(0,)) form — no in-kernel relayout.
        enc_all = jnp.concatenate(enc_blocks, axis=0)                 # (P, d)
        enc_all = jnp.pad(enc_all, ((0, self.p_pad - p_total),
                                    (0, _D_PAD - embed_dim)))
        self.txt_t = enc_all.T.astype(jnp.bfloat16)                   # (D_PAD, P_PAD)

        # Static column->key one-hot map (lane-dense per-key loss output).
        key_map = jnp.zeros((self.p_pad, self.nk_pad), jnp.float32)
        for ki, (o, c) in enumerate(self.key_layout):
            key_map = key_map.at[o:o + c, ki].set(1.0)
        self.key_map = key_map

        # Synthetic image encoder: linear projection with the CLIP image
        # normalization folded in (W' = diag(a) @ W, b' = b @ W with
        # a = 1/(2*std), b = (0.5 - mean)/std per flattened NCHW feature).
        feat_dim = img_ch * img_hw * img_hw
        self.f_pad = _round_up(feat_dim, 128)
        w_base = (jax.random.normal(keys[-1], (feat_dim, embed_dim), jnp.float32)
                  / math.sqrt(feat_dim))
        mean = jnp.repeat(jnp.asarray(_CLIP_MEAN, jnp.float32), img_hw * img_hw)
        std = jnp.repeat(jnp.asarray(_CLIP_STD, jnp.float32), img_hw * img_hw)
        a = 1.0 / (2.0 * std)
        b = (0.5 - mean) / std
        w_fused = a[:, None] * w_base                                 # (F, d)
        b_fused = b @ w_base                                          # (d,)
        self.w_fused = jnp.pad(
            w_fused, ((0, self.f_pad - feat_dim),
                      (0, _D_PAD - embed_dim))).astype(jnp.bfloat16)
        self.b_fused = jnp.pad(
            b_fused, (0, _D_PAD - embed_dim)).reshape(1, _D_PAD)      # f32

        # One compiled forward path (flatten/pad + mask build + fused kernel +
        # per-key reduction) per input shape.
        self._fwd = jax.jit(self._forward_all)

    # ------------------------------------------------------------------
    def _forward_all(self, imgs, text_idxs):
        n = imgs.shape[0]
        idxs = text_idxs.reshape(n).astype(jnp.int32)        # squeeze(dim=1)
        imgs_flat = imgs.reshape(n, -1).astype(jnp.float32)  # bf16 cast in-kernel
        f = imgs_flat.shape[1]

        # Batch padding / tiling: sublane minimum 8, <=256 rows per MXU pass.
        n_pad = max(8, _round_up(n, 8))
        if n_pad <= _MAX_BN:
            bn = n_pad
        else:
            bn = _MAX_BN
            n_pad = _round_up(n_pad, bn)

        if (n_pad, self.f_pad) != imgs_flat.shape:
            imgs_flat = jnp.pad(imgs_flat, ((0, n_pad - n),
                                            (0, self.f_pad - f)))

        # Precomputed selection mask with logit_scale/(100*n) folded in.
        # Out-of-range idxs are clamped per key (PyTorch indexing would raise).
        scale = self.logit_scale / (100.0 * n)
        cols = lax.broadcasted_iota(jnp.int32, (n, self.p_pad), 1)
        mask = jnp.zeros((n, self.p_pad), jnp.float32)
        for off, cnt in self.key_layout:                      # static python loop
            sel = jnp.clip(idxs, 0, cnt - 1) + off
            mask = mask + (cols == sel[:, None]).astype(jnp.float32)
        mask = mask * scale
        if n_pad != n:
            mask = jnp.pad(mask, ((0, n_pad - n), (0, 0)))    # padded rows -> 0

        tk = _pick_tk(self.f_pad, bn)
        out = _multi_clip_pallas(imgs_flat, self.w_fused, self.b_fused,
                                 self.txt_t, mask, self.key_map, bn=bn, tk=tk)
        losses = 1.0 - jnp.sum(out, axis=0)                   # (NK_PAD,)
        return losses[: len(self.text_keys)]

    # ------------------------------------------------------------------
    def forward(self, key, imgs, text_idxs):
        losses = self._fwd(imgs, text_idxs)
        if key == "all":
            return {k: losses[ki] for ki, k in enumerate(self.text_keys)}
        return losses[self.text_keys.index(key)]


# ----------------------------------------------------------------------------
if __name__ == "__main__":
    root = jax.random.PRNGKey(0)
    k_img, k_mod = jax.random.split(root)

    target_texts = {
        "style": ["prompt a", "prompt b", "prompt c", "prompt d"],   # P=4
        "content": ["prompt x", "prompt y", "prompt z"],             # P=3
    }
    module = MultiTextClipLoss(target_texts, k_mod, embed_dim=32, img_hw=16, img_ch=3)

    # Inputs: images in [-1, 1], NCHW; text_idxs shaped (n, 1) like the module.
    imgs = jax.random.uniform(k_img, (2, 3, 16, 16), jnp.float32, -1.0, 1.0)
    text_idxs = jnp.array([[0], [2]], dtype=jnp.int32)

    out_all = module.forward("all", imgs, text_idxs)
    out_one = module.forward("style", imgs, text_idxs)

    jax.block_until_ready(out_all)
    jax.block_until_ready(out_one)
    print("KERNEL_OK")
</pallas_src>

<mosaic_0001>
module attributes {stable_mosaic.version = 11 : i64} {
  func.func @_fused_kernel(%arg0: i32, %arg1: i32, %arg2: memref<8x768xf32, #tpu.memory_space<vmem>>, %arg3: memref<768x128xbf16, #tpu.memory_space<vmem>>, %arg4: memref<1x128xf32, #tpu.memory_space<vmem>>, %arg5: memref<128x128xbf16, #tpu.memory_space<vmem>>, %arg6: memref<8x128xf32, #tpu.memory_space<vmem>>, %arg7: memref<128x128xf32, #tpu.memory_space<vmem>>, %arg8: memref<8x128xf32, #tpu.memory_space<vmem>>, %arg9: memref<8x128xf32, #tpu.memory_space<vmem>>) attributes {dimension_semantics = [#tpu.dimension_semantics<parallel>, #tpu.dimension_semantics<arbitrary>], iteration_bounds = array<i64: 1, 1>, scalar_prefetch = 0 : i64, scratch_operands = 1 : i64, tpu.core_type = #tpu.core_type<tc>, window_params = [{transform_indices = @transform_0, window_bounds = array<i64: 8, 768>}, {transform_indices = @transform_1, window_bounds = array<i64: 768, 128>}, {pipeline_mode = #tpu.pipeline_mode<synchronous>, transform_indices = @transform_2, window_bounds = array<i64: 1, 128>}, {pipeline_mode = #tpu.pipeline_mode<synchronous>, transform_indices = @transform_3, window_bounds = array<i64: 128, 128>}, {transform_indices = @transform_4, window_bounds = array<i64: 8, 128>}, {pipeline_mode = #tpu.pipeline_mode<synchronous>, transform_indices = @transform_5, window_bounds = array<i64: 128, 128>}, {transform_indices = @transform_6, window_bounds = array<i64: 8, 128>}]} {
    %c0_i32 = arith.constant 0 : i32
    %0 = arith.cmpi eq, %arg1, %c0_i32 : i32
    %1 = arith.extui %0 : i1 to i32
    %c0_i32_0 = arith.constant 0 : i32
    %2 = arith.cmpi ne, %1, %c0_i32_0 : i32
    scf.if %2 {
      %cst_10 = arith.constant 0.000000e+00 : f32
      %13 = vector.broadcast %cst_10 : f32 to vector<8x128xf32>
      %c0_11 = arith.constant 0 : index
      %c0_12 = arith.constant 0 : index
      %14 = vector.load %arg9[%c0_11, %c0_12] : memref<8x128xf32, #tpu.memory_space<vmem>>, vector<8x128xf32>
      tpu.vector_store %arg9[%c0_11, %c0_12], %13 {strides = array<i32>} : memref<8x128xf32, #tpu.memory_space<vmem>>, vector<8x128xf32>,
    } else {
    }
    %c0 = arith.constant 0 : index
    %c0_1 = arith.constant 0 : index
    %3 = vector.load %arg9[%c0, %c0_1] : memref<8x128xf32, #tpu.memory_space<vmem>>, vector<8x128xf32>
    %c0_2 = arith.constant 0 : index
    %c0_3 = arith.constant 0 : index
    %4 = vector.load %arg2[%c0_2, %c0_3] : memref<8x768xf32, #tpu.memory_space<vmem>>, vector<8x768xf32>
    %5 = arith.truncf %4 : vector<8x768xf32> to vector<8x768xbf16>
    %c0_4 = arith.constant 0 : index
    %c0_5 = arith.constant 0 : index
    %6 = vector.load %arg3[%c0_4, %c0_5] : memref<768x128xbf16, #tpu.memory_space<vmem>>, vector<768x128xbf16>
    %cst = arith.constant dense<0.000000e+00> : vector<8x128xf32>
    %7 = tpu.matmul %5, %6, %cst {dimension_numbers = #tpu.dot_dimension_numbers<[1], [0], [0], [1], [0, 0, 1, 1], [], []>} : vector<8x768xbf16>, vector<768x128xbf16>, vector<8x128xf32> -> vector<8x128xf32>
    %8 = arith.addf %3, %7 : vector<8x128xf32>
    %c0_6 = arith.constant 0 : index
    %c0_7 = arith.constant 0 : index
    %9 = vector.load %arg9[%c0_6, %c0_7] : memref<8x128xf32, #tpu.memory_space<vmem>>, vector<8x128xf32>
    tpu.vector_store %arg9[%c0_6, %c0_7], %8 {strides = array<i32>} : memref<8x128xf32, #tpu.memory_space<vmem>>, vector<8x128xf32>,
    %c0_i32_8 = arith.constant 0 : i32
    %10 = arith.cmpi eq, %arg1, %c0_i32_8 : i32
    %11 = arith.extui %10 : i1 to i32
    %c0_i32_9 = arith.constant 0 : i32
    %12 = arith.cmpi ne, %11, %c0_i32_9 : i32
    scf.if %12 {
      %c0_10 = arith.constant 0 : index
      %c0_11 = arith.constant 0 : index
      %13 = vector.load %arg9[%c0_10, %c0_11] : memref<8x128xf32, #tpu.memory_space<vmem>>, vector<8x128xf32>
      %c0_12 = arith.constant 0 : index
      %c0_13 = arith.constant 0 : index
      %14 = vector.load %arg4[%c0_12, %c0_13] : memref<1x128xf32, #tpu.memory_space<vmem>>, vector<1x128xf32>
      %15 = vector.broadcast %14 : vector<1x128xf32> to vector<8x128xf32>
      %16 = arith.addf %13, %15 : vector<8x128xf32>
      %17 = arith.mulf %16, %16 : vector<8x128xf32>
      %cst_14 = arith.constant dense<0.000000e+00> : vector<8xf32>
      %18 = vector.multi_reduction <add>, %17, %cst_14 [1] : vector<8x128xf32> to vector<8xf32>
      %19 = vector.shape_cast %18 : vector<8xf32> to vector<8x1xf32>
      %cst_15 = arith.constant 9.99999996E-13 : f32
      %20 = vector.broadcast %cst_15 : f32 to vector<8x1xf32>
      %21 = arith.maximumf %19, %20 : vector<8x1xf32>
      %22 = math.rsqrt %21 : vector<8x1xf32>
      %23 = vector.broadcast %22 : vector<8x1xf32> to vector<8x128xf32>
      %24 = arith.mulf %16, %23 : vector<8x128xf32>
      %25 = arith.truncf %24 : vector<8x128xf32> to vector<8x128xbf16>
      %c0_16 = arith.constant 0 : index
      %c0_17 = arith.constant 0 : index
      %26 = vector.load %arg5[%c0_16, %c0_17] : memref<128x128xbf16, #tpu.memory_space<vmem>>, vector<128x128xbf16>
      %cst_18 = arith.constant dense<0.000000e+00> : vector<8x128xf32>
      %27 = tpu.matmul %25, %26, %cst_18 {dimension_numbers = #tpu.dot_dimension_numbers<[1], [0], [0], [1], [0, 0, 1, 1], [], []>} : vector<8x128xbf16>, vector<128x128xbf16>, vector<8x128xf32> -> vector<8x128xf32>
      %c0_19 = arith.constant 0 : index
      %c0_20 = arith.constant 0 : index
      %28 = vector.load %arg6[%c0_19, %c0_20] : memref<8x128xf32, #tpu.memory_space<vmem>>, vector<8x128xf32>
      %29 = arith.mulf %27, %28 : vector<8x128xf32>
      %30 = vector.shape_cast %29 : vector<8x128xf32> to vector<1x8x128xf32>
      %cst_21 = arith.constant dense<0.000000e+00> : vector<8x128xf32>
      %31 = vector.multi_reduction <add>, %30, %cst_21 [0] : vector<1x8x128xf32> to vector<8x128xf32>
      %c0_22 = arith.constant 0 : index
      %c0_23 = arith.constant 0 : index
      %32 = vector.load %arg7[%c0_22, %c0_23] : memref<128x128xf32, #tpu.memory_space<vmem>>, vector<128x128xf32>
      %cst_24 = arith.constant dense<0.000000e+00> : vector<8x128xf32>
      %33 = tpu.matmul %31, %32, %cst_24 {dimension_numbers = #tpu.dot_dimension_numbers<[1], [0], [0], [1], [0, 0, 1, 1], [], []>} : vector<8x128xf32>, vector<128x128xf32>, vector<8x128xf32> -> vector<8x128xf32>
      %c0_25 = arith.constant 0 : index
      %c0_26 = arith.constant 0 : index
      %34 = vector.load %arg8[%c0_25, %c0_26] : memref<8x128xf32, #tpu.memory_space<vmem>>, vector<8x128xf32>
      tpu.vector_store %arg8[%c0_25, %c0_26], %33 {strides = array<i32>} : memref<8x128xf32, #tpu.memory_space<vmem>>, vector<8x128xf32>,
    } else {
    }
    return
  }
  func.func @transform_0(%arg0: i32, %arg1: i32) -> (i32, i32) {
    %c0_i32 = arith.constant 0 : i32
    return %arg0, %arg1 : i32, i32
  }
  func.func @transform_1(%arg0: i32, %arg1: i32) -> (i32, i32) {
    %c0_i32 = arith.constant 0 : i32
    %c0_i32_0 = arith.constant 0 : i32
    return %arg1, %c0_i32 : i32, i32
  }
  func.func @transform_2(%arg0: i32, %arg1: i32) -> (i32, i32) {
    %c0_i32 = arith.constant 0 : i32
    %c0_i32_0 = arith.constant 0 : i32
    %c0_i32_1 = arith.constant 0 : i32
    return %c0_i32, %c0_i32_0 : i32, i32
  }
  func.func @transform_3(%arg0: i32, %arg1: i32) -> (i32, i32) {
    %c0_i32 = arith.constant 0 : i32
    %c0_i32_0 = arith.constant 0 : i32
    %c0_i32_1 = arith.constant 0 : i32
    return %c0_i32, %c0_i32_0 : i32, i32
  }
  func.func @transform_4(%arg0: i32, %arg1: i32) -> (i32, i32) {
    %c0_i32 = arith.constant 0 : i32
    %c0_i32_0 = arith.constant 0 : i32
    return %arg0, %c0_i32 : i32, i32
  }
  func.func @transform_5(%arg0: i32, %arg1: i32) -> (i32, i32) {
    %c0_i32 = arith.constant 0 : i32
    %c0_i32_0 = arith.constant 0 : i32
    %c0_i32_1 = arith.constant 0 : i32
    return %c0_i32, %c0_i32_0 : i32, i32
  }
  func.func @transform_6(%arg0: i32, %arg1: i32) -> (i32, i32) {
    %c0_i32 = arith.constant 0 : i32
    %c0_i32_0 = arith.constant 0 : i32
    return %arg0, %c0_i32 : i32, i32
  }
}

</mosaic_0001>

<bundles_post_ra>
// kernel: _forward_all.1
= control target key start
LH: loop header
LB: loop body
LE: loop exit
PB: predicated region body
PF: predicated region fallthrough
CT: control target
= control target key end

     0   :  { %11 = vsyncpa [#allocation4], 0  ;;  %s1096_s21 = smov [#allocation3]   ;;  %s1248_s0 = inlined_call_operand.vmem [shape: f32[8,768], index: 0, kind: input, shape index: {}]   ;;  %s1249_s1 = inlined_call_operand.hbm [shape: bf16[768,128], index: 1, kind: input, shape index: {}]   ;;  %s1250_s2 = inlined_call_operand.vmem [shape: f32[1,128], index: 2, kind: input, shape index: {}]   ;;  %s1251_s3 = inlined_call_operand.vmem [shape: bf16[128,128], index: 3, kind: input, shape index: {}]   ;;  %s1252_s4 = inlined_call_operand.vmem [shape: f32[8,128], index: 4, kind: input, shape index: {}]   ;;  %s1253_s5 = inlined_call_operand.vmem [shape: f32[128,128], index: 5, kind: input, shape index: {}]   ;;  %s1254_s6 = inlined_call_operand.vmem [shape: f32[8,128], index: 6, kind: output, shape index: {}]  }
   0x1   :  { %s19_s22 = sshll.u32 %s1096_s21, 4  ;;  %s1072_s25 = scalar_lea.hbm %s1249_s1, 6144  ;;  %s20_s22 = int_to_ptr.vmem [resolvable:$true] %s19_s22 }
   0x2   :  { %p1073_p0 = scmp.ne.s32.totalorder %s1249_s1, %s1072_s25  ;;  %p1076_p1 = scmp.lt.u32.totalorder %s1072_s25, %s1249_s1 }
   0x4   :  { %p1078_p2 = pnand %p1076_p1, %p1073_p0 }
   0x6   :  { %1081 = shalt.err (!%p1078_p2)
}
   0x7   :  { %s1082_s30 = scalar_lea.vmem %s20_s22, 6144  ;;  %p1087_p4 = scmp.lt.s32.totalorder %s20_s22, %s20_s22 }
   0x8   :  { %p1083_p3 = scmp.ne.s32.totalorder %s20_s22, %s1082_s30  ;;  %p1088_p5 = scmp.lt.s32.totalorder %s1082_s30, %s1082_s30 }
   0xa   :  { %p1089_p6 = por %p1088_p5, %p1087_p4 }
   0xc   :  { %p1090_p7 = pnand %p1089_p6, %p1083_p3 }
   0xe   :  { %1093 = shalt.err (!%p1090_p7)
}
   0xf   :  { %s1097_s7 = smov 64   ;;  %s1098_s8 = smov 4  }
  0x10   :  { %25 = dma.hbm_to_vmem [thread:$0]  %s1249_s1, 6144, %s20_s22, [#allocation4], %s1097_s7, %s1097_s7, %s1098_s8  }
  0x11   :  { %1094 = dma.done.wait [#allocation4], 6144  }
  0x12   :  { %1095 = vsyncadd [#allocation4], 4294961152  ;;  %v1014_v0 = vld [vmem:[#allocation3 + $0x40] sm:$0xff]   ;;  %v1018_v4 = vld [vmem:[#allocation3 + $0x48] sm:$0xff]   ;;  %v1099_v61 = vmov 0.0   ;;  %vm1100_vm0 = vmmov 0  }
  0x13   :  { %v1015_v1 = vld [vmem:[#allocation3 + $0xc0] sm:$0xff]   ;;  %837 = vmatprep.subr.bf16.mxu0 %v1014_v0  ;;  %v1019_v5 = vld [vmem:[#allocation3 + $0xc8] sm:$0xff]   ;;  %v1022_v8 = vld [vmem:[#allocation3 + $0x50] sm:$0xff]  }
  0x14   :  { %v1016_v2 = vld [vmem:[#allocation3] sm:$0xff]   ;;  %859 = vmatprep.subr.bf16.mxu1 %v1015_v1  ;;  %v1020_v6 = vld [vmem:[#allocation3 + $0x8] sm:$0xff]   ;;  %v1023_v9 = vld [vmem:[#allocation3 + $0xd0] sm:$0xff]  }
  0x15   :  { %v1017_v3 = vld [vmem:[#allocation3 + $0x80] sm:$0xff]   ;;  %838 = vmatpush3.bf16.msra.mxu0 %v1016_v2  ;;  %v1021_v7 = vld [vmem:[#allocation3 + $0x88] sm:$0xff]   ;;  %v1024_v10 = vld [vmem:[#allocation3 + $0x10] sm:$0xff]  }
  0x16   :  { %860 = vmatpush3.bf16.msra.mxu1 %v1017_v3  ;;  %839 = vmatprep.subr.bf16.mxu0 %v1018_v4  ;;  %v1025_v11 = vld [vmem:[#allocation3 + $0x90] sm:$0xff]   ;;  %v1026_v12 = vld [vmem:[#allocation3 + $0x58] sm:$0xff]   ;;  %v1030_v16 = vld [vmem:[#allocation3 + $0x60] sm:$0xff]  }
  0x17   :  { %861 = vmatprep.subr.bf16.mxu1 %v1019_v5  ;;  %v1027_v13 = vld [vmem:[#allocation3 + $0xd8] sm:$0xff]   ;;  %v1031_v17 = vld [vmem:[#allocation3 + $0xe0] sm:$0xff]   ;;  %v1034_v20 = vld [vmem:[#allocation3 + $0x68] sm:$0xff]  }
  0x18   :  { %v1028_v14 = vld [vmem:[#allocation3 + $0x18] sm:$0xff]   ;;  %v1032_v18 = vld [vmem:[#allocation3 + $0x20] sm:$0xff]   ;;  %v1035_v21 = vld [vmem:[#allocation3 + $0xe8] sm:$0xff]  }
  0x19   :  { %840 = vmatpush3.bf16.msra.mxu0 %v1020_v6  ;;  %v1029_v15 = vld [vmem:[#allocation3 + $0x98] sm:$0xff]   ;;  %v1033_v19 = vld [vmem:[#allocation3 + $0xa0] sm:$0xff]   ;;  %v1036_v22 = vld [vmem:[#allocation3 + $0x28] sm:$0xff]  }
  0x1a   :  { %862 = vmatpush3.bf16.msra.mxu1 %v1021_v7  ;;  %841 = vmatprep.subr.bf16.mxu0 %v1022_v8  ;;  %v1037_v23 = vld [vmem:[#allocation3 + $0xa8] sm:$0xff]   ;;  %v1038_v24 = vld [vmem:[#allocation3 + $0x70] sm:$0xff]   ;;  %v1042_v28 = vld [vmem:[#allocation3 + $0x78] sm:$0xff]  }
  0x1b   :  { %863 = vmatprep.subr.bf16.mxu1 %v1023_v9  ;;  %v1039_v25 = vld [vmem:[#allocation3 + $0xf0] sm:$0xff]   ;;  %v1043_v29 = vld [vmem:[#allocation3 + $0xf8] sm:$0xff]   ;;  %v45_v32 = vld [vmem:[%s1248_s0 + $0x8] sm:$0xff] }
  0x1c   :  { %v1040_v26 = vld [vmem:[#allocation3 + $0x30] sm:$0xff]   ;;  %v1044_v30 = vld [vmem:[#allocation3 + $0x38] sm:$0xff]   ;;  %v44_v34 = vld [vmem:[%s1248_s0] sm:$0xff]  ;;  %v51_v35 = vpack.c.bf16 %v45_v32, %v45_v32 }
  0x1d   :  { %842 = vmatpush3.bf16.msra.mxu0 %v1024_v10  ;;  %v1041_v27 = vld [vmem:[#allocation3 + $0xb0] sm:$0xff]   ;;  %v1045_v31 = vld [vmem:[#allocation3 + $0xb8] sm:$0xff]   ;;  %v50_v37 = vpack.c.bf16 %v44_v34, %v44_v34  ;;  %v1046_v40 = vld [vmem:[#allocation3 + $0x140] sm:$0xff]  }
  0x1e   :  { %864 = vmatpush3.bf16.msra.mxu1 %v1025_v11  ;;  %843 = vmatprep.subr.bf16.mxu0 %v1026_v12  ;;  %v47_v33 = vld [vmem:[%s1248_s0 + $0x18] sm:$0xff]  ;;  %v46_v38 = vld [vmem:[%s1248_s0 + $0x10] sm:$0xff]  ;;  %v1047_v41 = vld [vmem:[#allocation3 + $0x100] sm:$0xff]  }
  0x1f   :  { %865 = vmatprep.subr.bf16.mxu1 %v1027_v13  ;;  %v53_v36 = vpack.c.bf16 %v47_v33, %v47_v33  ;;  %v52_v39 = vpack.c.bf16 %v46_v38, %v46_v38  ;;  %472 = vmatprep.mubr.bf16.mxu0 %v51_v35  ;;  %v1048_v42 = vld [vmem:[#allocation3 + $0x148] sm:$0xff]   ;;  %v1050_v44 = vld [vmem:[#allocation3 + $0x150] sm:$0xff]   ;;  %v1052_v46 = vld [vmem:[#allocation3 + $0x158] sm:$0xff]  }
  0x20   :  { %v1049_v43 = vld [vmem:[#allocation3 + $0x108] sm:$0xff]   ;;  %v1051_v45 = vld [vmem:[#allocation3 + $0x110] sm:$0xff]   ;;  %v1053_v47 = vld [vmem:[#allocation3 + $0x118] sm:$0xff]  }
  0x21   :  { %844 = vmatpush3.bf16.msra.mxu0 %v1028_v14  ;;  %512 = vmatprep.mubr.bf16.mxu1 %v53_v36  ;;  %v1054_v48 = vld [vmem:[#allocation3 + $0x160] sm:$0xff]   ;;  %v1056_v50 = vld [vmem:[#allocation3 + $0x168] sm:$0xff]   ;;  %v1058_v54 = vld [vmem:[#allocation3 + $0x170] sm:$0xff]  }
  0x22   :  { %866 = vmatpush3.bf16.msra.mxu1 %v1029_v15  ;;  %845 = vmatprep.subr.bf16.mxu0 %v1030_v16  ;;  %v1055_v49 = vld [vmem:[#allocation3 + $0x120] sm:$0xff]   ;;  %v49_v51 = vld [vmem:[%s1248_s0 + $0x28] sm:$0xff]  ;;  %v1059_v55 = vld [vmem:[#allocation3 + $0x130] sm:$0xff]  }
  0x23   :  { %867 = vmatprep.subr.bf16.mxu1 %v1031_v17  ;;  %v55_v52 = vpack.c.bf16 %v49_v51, %v49_v51  ;;  %v1057_v53 = vld [vmem:[#allocation3 + $0x128] sm:$0xff]   ;;  %v1060_v56 = vld [vmem:[#allocation3 + $0x178] sm:$0xff]   ;;  %v48_v58 = vld [vmem:[%s1248_s0 + $0x20] sm:$0xff] }
  0x24   :  { %v1061_v57 = vld [vmem:[#allocation3 + $0x138] sm:$0xff]   ;;  %v54_v59 = vpack.c.bf16 %v48_v58, %v48_v58  ;;  %v1062_v60 = vld [vmem:[%s1251_s3] sm:$0xff]   ;;  %v1063_v62 = vld [vmem:[%s1251_s3 + $0x8] sm:$0xff]  }
  0x25   :  { %846 = vmatpush3.bf16.msra.mxu0 %v1032_v18  ;;  %v1064_v63 = vld [vmem:[%s1251_s3 + $0x10] sm:$0xff]   ;;  %v1065_v0 = vld [vmem:[%s1251_s3 + $0x18] sm:$0xff]   ;;  %v828_v17 = vld [vmem:[%s1250_s2] ss:$0 sm:$0xff] }
  0x26   :  { %868 = vmatpush3.bf16.msra.mxu1 %v1033_v19  ;;  %847 = vmatprep.subr.bf16.mxu0 %v1034_v20  ;;  %v692_v32 = vld [vmem:[%s1253_s5 + $0x20] sm:$0xff]  ;;  %v693_v33 = vld [vmem:[%s1253_s5 + $0x28] sm:$0xff]  ;;  %v694_v35 = vld [vmem:[%s1253_s5 + $0x30] sm:$0xff] }
  0x27   :  { %869 = vmatprep.subr.bf16.mxu1 %v1035_v21  ;;  %v1066_v21 = vld [vmem:[%s1251_s3 + $0x20] sm:$0xff]   ;;  %v991_v34 = vpack.c.bf16 %v693_v33, %v692_v32  ;;  %v695_v36 = vld [vmem:[%s1253_s5 + $0x38] sm:$0xff] }
  0x28   :  { %v696_v38 = vld [vmem:[%s1253_s5 + $0x40] sm:$0xff] }
  0x29   :  { %848 = vmatpush3.bf16.msra.mxu0 %v1036_v22  ;;  %v1067_v22 = vld [vmem:[%s1251_s3 + $0x28] sm:$0xff]  }
  0x2a   :  { %870 = vmatpush3.bf16.msra.mxu1 %v1037_v23  ;;  %849 = vmatprep.subr.bf16.mxu0 %v1038_v24  ;;  %v1068_v23 = vld [vmem:[%s1251_s3 + $0x30] sm:$0xff]   ;;  %v1069_v24 = vld [vmem:[%s1251_s3 + $0x38] sm:$0xff]  }
  0x2b   :  { %871 = vmatprep.subr.bf16.mxu1 %v1039_v25  ;;  %v688_v25 = vld [vmem:[%s1253_s5] sm:$0xff] }
  0x2d   :  { %850 = vmatpush3.bf16.msra.mxu0 %v1040_v26  ;;  %v689_v26 = vld [vmem:[%s1253_s5 + $0x8] sm:$0xff] }
  0x2e   :  { %872 = vmatpush3.bf16.msra.mxu1 %v1041_v27  ;;  %851 = vmatprep.subr.bf16.mxu0 %v1042_v28  ;;  %v690_v27 = vld [vmem:[%s1253_s5 + $0x10] sm:$0xff]  ;;  %v1101_v28 = vmov 0.0|0.0  }
  0x2f   :  { %873 = vmatprep.subr.bf16.mxu1 %v1043_v29  ;;  %v985_v29 = vpack.c.bf16 %v689_v26, %v688_v25 }
  0x31   :  { %852 = vmatpush3.bf16.msra.mxu0 %v1044_v30  ;;  %v691_v30 = vld [vmem:[%s1253_s5 + $0x18] sm:$0xff] }
  0x32   :  { %874 = vmatpush3.bf16.msra.mxu1 %v1045_v31  ;;  %881 = vmatprep.subr.bf16.mxu0 %v1046_v40  ;;  %v988_v31 = vpack.c.bf16 %v691_v30, %v690_v27 }
  0x33   :  { %929 = vmatprep.subr.bf16.mxu1 %v1099_v61 }
  0x34   :  { %473 = vmatmul.mubr.bf16.vlgmr.msra.gmra.mrb[0].mxu0 %v50_v37  ;;  %v994_v37 = vpack.c.bf16 %v695_v36, %v694_v35 }
  0x35   :  { %513 = vmatmul.mubr.bf16.vlgmr.msra.gmra.mrb[0].mxu1 %v52_v39  ;;  %882 = vmatpush3.bf16.msra.mxu0 %v1047_v41  ;;  %v697_v39 = vld [vmem:[%s1253_s5 + $0x48] sm:$0xff]  ;;  %v698_v41 = vld [vmem:[%s1253_s5 + $0x50] sm:$0xff] }
  0x36   :  { %883 = vmatprep.subr.bf16.mxu0 %v1048_v42  ;;  %552 = vmatprep.mubr.bf16.mxu0 %v55_v52  ;;  %v997_v40 = vpack.c.bf16 %v697_v39, %v696_v38  ;;  %v699_v42 = vld [vmem:[%s1253_s5 + $0x58] sm:$0xff]  ;;  %v702_v52 = vld [vmem:[%s1253_s5 + $0x70] sm:$0xff] }
  0x37   :  { %930 = vmatpush3.bf16.msra.mxu1 %v1062_v60  ;;  %945 = vmatprep.mubr.msk.bf16.mxu1 %vm1100_vm0, %v1099_v61 }
  0x38   :  { %931 = vmatprep.subr.bf16.mxu1 %v1099_v61 }
  0x39   :  { %884 = vmatpush3.bf16.msra.mxu0 %v1049_v43  ;;  %v1000_v43 = vpack.c.bf16 %v699_v42, %v698_v41 }
  0x3a   :  { %885 = vmatprep.subr.bf16.mxu0 %v1050_v44  ;;  %v700_v44 = vld [vmem:[%s1253_s5 + $0x60] sm:$0xff] }
  0x3b   :  { %932 = vmatpush3.bf16.msra.mxu1 %v1063_v62 }
  0x3c   :  { %933 = vmatprep.subr.bf16.mxu1 %v1099_v61 }
  0x3d   :  { %886 = vmatpush3.bf16.msra.mxu0 %v1051_v45  ;;  %v701_v45 = vld [vmem:[%s1253_s5 + $0x68] sm:$0xff] }
  0x3e   :  { %887 = vmatprep.subr.bf16.mxu0 %v1052_v46  ;;  %v1003_v46 = vpack.c.bf16 %v701_v45, %v700_v44 }
  0x3f   :  { %934 = vmatpush3.bf16.msra.mxu1 %v1064_v63 }
  0x40   :  { %935 = vmatprep.subr.bf16.mxu1 %v1099_v61 }
  0x41   :  { %888 = vmatpush3.bf16.msra.mxu0 %v1053_v47 }
  0x42   :  { %889 = vmatprep.subr.bf16.mxu0 %v1054_v48 }
  0x43   :  { %936 = vmatpush3.bf16.msra.mxu1 %v1065_v0 }
  0x44   :  { %937 = vmatprep.subr.bf16.mxu1 %v1099_v61 }
  0x45   :  { %890 = vmatpush3.bf16.msra.mxu0 %v1055_v49 }
  0x46   :  { %891 = vmatprep.subr.bf16.mxu0 %v1056_v50 }
  0x47   :  { %938 = vmatpush3.bf16.msra.mxu1 %v1066_v21 }
  0x48   :  { %939 = vmatprep.subr.bf16.mxu1 %v1099_v61 }
  0x49   :  { %892 = vmatpush3.bf16.msra.mxu0 %v1057_v53  ;;  %v703_v53 = vld [vmem:[%s1253_s5 + $0x78] sm:$0xff] }
  0x4a   :  { %893 = vmatprep.subr.bf16.mxu0 %v1058_v54  ;;  %v1006_v54 = vpack.c.bf16 %v703_v53, %v702_v52 }
  0x4b   :  { %940 = vmatpush3.bf16.msra.mxu1 %v1067_v22 }
  0x4c   :  { %941 = vmatprep.subr.bf16.mxu1 %v1099_v61 }
  0x4d   :  { %894 = vmatpush3.bf16.msra.mxu0 %v1059_v55  ;;  %v685_v55 = vld [vmem:[%s1252_s4] sm:$0xff] }
  0x4e   :  { %895 = vmatprep.subr.bf16.mxu0 %v1060_v56 }
  0x4f   :  { %942 = vmatpush3.bf16.msra.mxu1 %v1068_v23 }
  0x50   :  { %943 = vmatprep.subr.bf16.mxu1 %v1099_v61 }
  0x51   :  { %896 = vmatpush3.bf16.msra.mxu0 %v1061_v57 }
  0x52   :  { %984 = vmatprep.subr.bf16.mxu0 %v1101_v28 }
  0x53   :  { %944 = vmatpush3.bf16.msra.mxu1 %v1069_v24 }
  0x54   :  { %553 = vmatmul.mubr.bf16.vlgmr.msra.gmra.mrb[4].mxu0 %v54_v59 }
  0x55   :  { %981 = vmatprep.mubr.msk.f32.mxu0 %vm1100_vm0, %v1099_v61  ;;  %986 = vmatpush3.bf16.msra.mxu0 %v985_v29 }
  0x56   :  { %987 = vmatprep.subr.bf16.mxu0 %v1101_v28 }
  0x59   :  { %989 = vmatpush3.bf16.msra.mxu0 %v988_v31 }
  0x5a   :  { %990 = vmatprep.subr.bf16.mxu0 %v1101_v28 }
  0x5d   :  { %992 = vmatpush3.bf16.msra.mxu0 %v991_v34 }
  0x5e   :  { %993 = vmatprep.subr.bf16.mxu0 %v1101_v28 }
  0x61   :  { %995 = vmatpush3.bf16.msra.mxu0 %v994_v37 }
  0x62   :  { %996 = vmatprep.subr.bf16.mxu0 %v1101_v28 }
  0x65   :  { %998 = vmatpush3.bf16.msra.mxu0 %v997_v40 }
  0x66   :  { %999 = vmatprep.subr.bf16.mxu0 %v1101_v28 }
  0x69   :  { %1001 = vmatpush3.bf16.msra.mxu0 %v1000_v43 }
  0x6a   :  { %1002 = vmatprep.subr.bf16.mxu0 %v1101_v28 }
  0x6d   :  { %1004 = vmatpush3.bf16.msra.mxu0 %v1003_v46 }
  0x6e   :  { %1005 = vmatprep.subr.bf16.mxu0 %v1101_v28 }
  0x71   :  { %1007 = vmatpush3.bf16.msra.mxu0 %v1006_v54 }
 0x107   :  { %v853_v1 = vpop.f32.mrb[0].mxu0 }
 0x108   :  { %v875_v2 = vpop.f32.mrb[0].mxu1  ;;  %v854_v3 = vpop.f32.mrb[1].mxu0 }
 0x109   :  { %v876_v4 = vpop.f32.mrb[1].mxu1  ;;  %v855_v5 = vadd.f32 %v854_v3, %v853_v1  ;;  %v856_v7 = vpop.f32.mrb[2].mxu0 }
 0x10a   :  { %v877_v6 = vadd.f32 %v876_v4, %v875_v2  ;;  %v878_v8 = vpop.f32.mrb[2].mxu1  ;;  %v857_v9 = vpop.f32.mrb[3].mxu0 }
 0x10b   :  { %v879_v10 = vpop.f32.mrb[3].mxu1 }
 0x10c   :  { %v515_v11 = vadd.f32 %v877_v6, %v855_v5 }
 0x127   :  { %v897_v12 = vpop.f32.mrb[4].mxu0 }
 0x128   :  { %v898_v13 = vpop.f32.mrb[5].mxu0 }
 0x129   :  { %v899_v14 = vadd.f32 %v898_v13, %v897_v12  ;;  %v900_v15 = vpop.f32.mrb[6].mxu0 }
 0x12a   :  { %v901_v16 = vpop.f32.mrb[7].mxu0 }
 0x12b   :  { %v555_v18 = vadd.f32 %v899_v14, %v515_v11 }
 0x12d   :  { %v573_v19 = vadd.f32 %v828_v17, %v555_v18 }
 0x12f   :  { %v574_v20 = vmul.f32 %v573_v19, %v573_v19 }
 0x131   :  { %575 = vadd.xlane.f32.xlu0 %v574_v20 }
 0x1be   :  { %v576_v47 = vpop.xlane.xlu0 %575 }
 0x1bf   :  { %v577_v48 = vmax.f32 %v576_v47, 1e-12 }
 0x1c1   :  { %1070 = vrsqrt.f32 %v577_v48 }
 0x1cb   :  { %v1071_v49 = vpop.eup %1070 }
 0x1cc   :  { %v579_v50 = vmul.f32 %v1071_v49, %v573_v19 }
 0x1ce   :  { %v580_v51 = vpack.c.bf16 %v579_v50, %v579_v50 }
 0x1d0   :  { %946 = vmatmul.mubr.bf16.vlgmr.msra.gmra.mrb[4].mxu1 %v580_v51 }
 0x2a3   :  { %v679_v56 = vpop.f32.mrb[4].mxu1 }
 0x2a4   :  { %v686_v57 = vmul.f32 %v685_v55, %v679_v56  ;;  %v947_v58 = vpop.f32.mrb[5].mxu1 }
 0x2a5   :  { %v682_v59 = vpop.f32.mrb[6].mxu1 }
 0x2a6   :  { %v948_v60 = vpop.f32.mrb[7].mxu1  ;;  %982 = vmatmul.mubr.f32.vlgmr.msra.gmra.mrb[8].mxu0 %v686_v57 }
 0x379   :  { %v770_v61 = vpop.f32.mrb[8].mxu0 }
 0x37a   :  { %774 = vst [vmem:[%s1254_s6] sm:$0xff] %v770_v61  ;;  %v983_v62 = vpop.f32.mrb[9].mxu0 }
 0x37b   :  { %779 = vsyncpa [#allocation4], 1 }

</bundles_post_ra>
